<compile_context>
chip_gen: v6e
topology: v6e:2x2x1
jax: 0.10.0
libtpu: 0.0.40
codegen_flags: <defaults>
</compile_context>

<pallas_src>
import functools

import jax
import jax.numpy as jnp
from jax.experimental import pallas as pl
from jax.experimental.pallas import tpu as pltpu

# ITU-R 601-2 luma weights (same as torchvision's rgb_to_grayscale).
_RW, _GW, _BW = 0.2989, 0.587, 0.114

# Whole-image single-pass path while the padded image block stays small:
# rows <= 1024 -> block = 3*1024*128*4 B = 1.5 MiB (f32), ~6 MiB with in/out
# double-buffering.  Larger images use the row-tiled apply kernel.
_SINGLE_PASS_MAX_ROWS = 1024
_ROW_TILE = 512  # 3*512*128*4 B = 768 KiB per block in the tiled path.


def _to_lane_dense(image, rows_pad):
    """(B, C, H, W) -> zero-padded lane-dense (B, C, rows_pad, 128) view."""
    B, C, H, W = image.shape
    S = H * W
    flat = image.reshape(B, C, S)
    pad = rows_pad * 128 - S
    if pad:
        flat = jnp.pad(flat, ((0, 0), (0, 0), (0, pad)))
    return flat.reshape(B, C, rows_pad, 128)


def _from_lane_dense(out, shape):
    B, C, H, W = shape
    S = H * W
    return out.reshape(B, C, -1)[:, :, :S].reshape(B, C, H, W)


def _contrast_single_pass_kernel(img_ref, out_ref, *, factor, inv_n):
    # img_ref block: (1, C, rows, 128) -- the whole (zero-padded) image.
    imgf = img_ref[...].astype(jnp.float32)
    # Per-channel sums: padded zeros contribute nothing; dividing by the true
    # pixel count (inv_n) gives the exact grayscale mean.
    gray_sum = (_RW * jnp.sum(imgf[0, 0])
                + _GW * jnp.sum(imgf[0, 1])
                + _BW * jnp.sum(imgf[0, 2]))
    offset = (1.0 - factor) * (gray_sum * inv_n)  # scalar, hoisted
    out_ref[...] = jnp.clip(factor * imgf + offset, 0.0, 1.0).astype(out_ref.dtype)


def _contrast_apply_kernel(means_ref, img_ref, out_ref, *, factor):
    # Row-tiled streaming blend; per-image gray mean arrives via scalar
    # prefetch (SMEM).  img_ref block: (1, C, row_tile, 128).
    b = pl.program_id(0)
    offset = (1.0 - factor) * means_ref[b]  # scalar, hoisted
    imgf = img_ref[...].astype(jnp.float32)
    out_ref[...] = jnp.clip(factor * imgf + offset, 0.0, 1.0).astype(out_ref.dtype)


def adjust_contrast(image, factor, *,
                    single_pass_max_rows=_SINGLE_PASS_MAX_ROWS,
                    row_tile=_ROW_TILE):
    """Pallas adjust_contrast for float NCHW images in [0, 1]."""
    B, C, H, W = image.shape
    assert C == 3, "adjust_contrast grayscale conversion requires 3 channels"
    assert row_tile > 0 and row_tile % 8 == 0, "row_tile must be a multiple of 8"
    # TODO(synk): uint8 path (bound=255 + rounding on the blend) not implemented;
    # float images in [0, 1] are assumed, matching torchvision's float path.

    factor = float(factor)
    S = H * W
    rows = (S + 127) // 128

    if rows <= single_pass_max_rows:
        # Single pass: one HBM read + one write, gray-mean reduce in-kernel.
        x = _to_lane_dense(image, rows)
        out = pl.pallas_call(
            functools.partial(_contrast_single_pass_kernel,
                              factor=factor, inv_n=1.0 / S),
            out_shape=jax.ShapeDtypeStruct(x.shape, image.dtype),
            grid=(B,),
            in_specs=[pl.BlockSpec((1, C, rows, 128), lambda b: (b, 0, 0, 0))],
            out_specs=pl.BlockSpec((1, C, rows, 128), lambda b: (b, 0, 0, 0)),
            compiler_params=pltpu.CompilerParams(
                dimension_semantics=("parallel",)),
        )(x)
    else:
        # Large images: VMEM-bounded row-tiled streaming apply.  Per-image
        # means are a streamed XLA reduce, prefetched into SMEM.
        rows_pad = -(-rows // row_tile) * row_tile
        n_tiles = rows_pad // row_tile
        x = _to_lane_dense(image, rows_pad)
        gray = _RW * image[:, 0] + _GW * image[:, 1] + _BW * image[:, 2]
        means = gray.astype(jnp.float32).reshape(B, -1).mean(axis=1)  # (B,)
        out = pl.pallas_call(
            functools.partial(_contrast_apply_kernel, factor=factor),
            out_shape=jax.ShapeDtypeStruct(x.shape, image.dtype),
            grid_spec=pltpu.PrefetchScalarGridSpec(
                num_scalar_prefetch=1,
                grid=(B, n_tiles),
                in_specs=[pl.BlockSpec((1, C, row_tile, 128),
                                       lambda b, t, means: (b, 0, t, 0))],
                out_specs=pl.BlockSpec((1, C, row_tile, 128),
                                       lambda b, t, means: (b, 0, t, 0)),
            ),
            compiler_params=pltpu.CompilerParams(
                dimension_semantics=("parallel", "parallel")),
        )(means, x)

    return _from_lane_dense(out, (B, C, H, W))


def random_adjust_contrast(image, key, p, factor, target=None):
    """JAX/Pallas equivalent of RandomAdjustContrast.forward.

    Returns (image_out, target, applied_bool).  The Bernoulli(p) draw gates a
    lax.cond so the kernel is skipped entirely when not applied.
    """
    applied = jax.random.uniform(key, ()) < p
    out = jax.lax.cond(applied,
                       lambda img: adjust_contrast(img, factor),
                       lambda img: img,
                       image)
    return out, target, applied


def _reference_adjust(image, factor):
    gray = _RW * image[:, 0] + _GW * image[:, 1] + _BW * image[:, 2]
    mean = gray.mean(axis=(-2, -1), keepdims=True)[:, None]  # (B,1,1,1)
    return jnp.clip(factor * image + (1.0 - factor) * mean, 0.0, 1.0)


if __name__ == "__main__":
    key = jax.random.PRNGKey(0)
    k1, k2, k3, kc = jax.random.split(key, 4)
    p, factor = 0.5, 1.7

    # 1) Small image -> single-pass path (and the same image through the
    #    forced tiled path).
    img_a = jax.random.uniform(k1, (2, 3, 16, 16), dtype=jnp.float32)
    ref_a = _reference_adjust(img_a, factor)
    out_a = adjust_contrast(img_a, factor)
    out_a_t = adjust_contrast(img_a, factor, single_pass_max_rows=0, row_tile=8)
    jax.block_until_ready((out_a, out_a_t))
    assert jnp.allclose(out_a, ref_a, atol=1e-5, rtol=1e-5)
    assert jnp.allclose(out_a_t, ref_a, atol=1e-5, rtol=1e-5)

    # 2) Odd spatial size -> exercises flatten + zero padding on both paths.
    img_b = jax.random.uniform(k2, (1, 3, 17, 20), dtype=jnp.float32)
    ref_b = _reference_adjust(img_b, factor)
    out_b = adjust_contrast(img_b, factor)
    out_b_t = adjust_contrast(img_b, factor, single_pass_max_rows=0, row_tile=8)
    jax.block_until_ready((out_b, out_b_t))
    assert jnp.allclose(out_b, ref_b, atol=1e-5, rtol=1e-5)
    assert jnp.allclose(out_b_t, ref_b, atol=1e-5, rtol=1e-5)

    # 3) Multi-tile tiled path (grid (B, n_tiles) with n_tiles > 1).
    img_c = jax.random.uniform(k3, (2, 3, 32, 64), dtype=jnp.float32)
    ref_c = _reference_adjust(img_c, factor)
    out_c_t = adjust_contrast(img_c, factor, single_pass_max_rows=0, row_tile=8)
    jax.block_until_ready(out_c_t)
    assert jnp.allclose(out_c_t, ref_c, atol=1e-5, rtol=1e-5)

    # 4) Full module semantics: Bernoulli(p) gate + lax.cond skip.
    out_full, target, applied = random_adjust_contrast(img_a, kc, p, factor)
    jax.block_until_ready(out_full)
    ref_full = jnp.where(applied, ref_a, img_a)
    assert jnp.allclose(out_full, ref_full, atol=1e-5, rtol=1e-5)

    print("KERNEL_OK")
</pallas_src>

<mosaic_0001>
module attributes {stable_mosaic.version = 11 : i64} {
  func.func @_contrast_single_pass_kernel(%arg0: i32, %arg1: memref<1x3x2x128xf32, #tpu.memory_space<vmem>>, %arg2: memref<1x3x2x128xf32, #tpu.memory_space<vmem>>) attributes {dimension_semantics = [#tpu.dimension_semantics<parallel>], iteration_bounds = array<i64: 2>, scalar_prefetch = 0 : i64, scratch_operands = 0 : i64, tpu.core_type = #tpu.core_type<tc>, window_params = [{transform_indices = @transform_0, window_bounds = array<i64: 1, 3, 2, 128>}, {transform_indices = @transform_1, window_bounds = array<i64: 1, 3, 2, 128>}]} {
    %c0 = arith.constant 0 : index
    %c0_0 = arith.constant 0 : index
    %c0_1 = arith.constant 0 : index
    %c0_2 = arith.constant 0 : index
    %0 = vector.load %arg1[%c0, %c0_0, %c0_1, %c0_2] : memref<1x3x2x128xf32, #tpu.memory_space<vmem>>, vector<1x3x2x128xf32>
    %1 = vector.extract_strided_slice %0 {offsets = [0, 0, 0, 0], sizes = [1, 1, 2, 128], strides = [1, 1, 1, 1]} : vector<1x3x2x128xf32> to vector<1x1x2x128xf32>
    %2 = vector.shape_cast %1 : vector<1x1x2x128xf32> to vector<2x128xf32>
    %3 = vector.shape_cast %2 : vector<2x128xf32> to vector<1x2x128xf32>
    %cst = arith.constant dense<0.000000e+00> : vector<1xf32>
    %4 = vector.multi_reduction <add>, %3, %cst [1, 2] : vector<1x2x128xf32> to vector<1xf32>
    %5 = vector.shape_cast %4 : vector<1xf32> to vector<1x1x1xf32>
    %6 = vector.extract %5[0, 0, 0] : f32 from vector<1x1x1xf32>
    %cst_3 = arith.constant 2.989000e-01 : f32
    %7 = arith.mulf %cst_3, %6 : f32
    %8 = vector.extract_strided_slice %0 {offsets = [0, 1, 0, 0], sizes = [1, 1, 2, 128], strides = [1, 1, 1, 1]} : vector<1x3x2x128xf32> to vector<1x1x2x128xf32>
    %9 = vector.shape_cast %8 : vector<1x1x2x128xf32> to vector<2x128xf32>
    %10 = vector.shape_cast %9 : vector<2x128xf32> to vector<1x2x128xf32>
    %cst_4 = arith.constant dense<0.000000e+00> : vector<1xf32>
    %11 = vector.multi_reduction <add>, %10, %cst_4 [1, 2] : vector<1x2x128xf32> to vector<1xf32>
    %12 = vector.shape_cast %11 : vector<1xf32> to vector<1x1x1xf32>
    %13 = vector.extract %12[0, 0, 0] : f32 from vector<1x1x1xf32>
    %cst_5 = arith.constant 5.870000e-01 : f32
    %14 = arith.mulf %cst_5, %13 : f32
    %15 = arith.addf %7, %14 : f32
    %16 = vector.extract_strided_slice %0 {offsets = [0, 2, 0, 0], sizes = [1, 1, 2, 128], strides = [1, 1, 1, 1]} : vector<1x3x2x128xf32> to vector<1x1x2x128xf32>
    %17 = vector.shape_cast %16 : vector<1x1x2x128xf32> to vector<2x128xf32>
    %18 = vector.shape_cast %17 : vector<2x128xf32> to vector<1x2x128xf32>
    %cst_6 = arith.constant dense<0.000000e+00> : vector<1xf32>
    %19 = vector.multi_reduction <add>, %18, %cst_6 [1, 2] : vector<1x2x128xf32> to vector<1xf32>
    %20 = vector.shape_cast %19 : vector<1xf32> to vector<1x1x1xf32>
    %21 = vector.extract %20[0, 0, 0] : f32 from vector<1x1x1xf32>
    %cst_7 = arith.constant 1.140000e-01 : f32
    %22 = arith.mulf %cst_7, %21 : f32
    %23 = arith.addf %15, %22 : f32
    %cst_8 = arith.constant 3.906250e-03 : f32
    %24 = arith.mulf %23, %cst_8 : f32
    %cst_9 = arith.constant -0.699999988 : f32
    %25 = arith.mulf %cst_9, %24 : f32
    %cst_10 = arith.constant 1.700000e+00 : f32
    %26 = vector.broadcast %cst_10 : f32 to vector<1x3x2x128xf32>
    %27 = arith.mulf %26, %0 : vector<1x3x2x128xf32>
    %28 = vector.broadcast %25 : f32 to vector<1x3x2x128xf32>
    %29 = arith.addf %27, %28 : vector<1x3x2x128xf32>
    %cst_11 = arith.constant 0.000000e+00 : f32
    %cst_12 = arith.constant 1.000000e+00 : f32
    %30 = vector.broadcast %cst_11 : f32 to vector<1x3x2x128xf32>
    %31 = arith.maximumf %30, %29 : vector<1x3x2x128xf32>
    %32 = vector.broadcast %cst_12 : f32 to vector<1x3x2x128xf32>
    %33 = arith.minimumf %32, %31 : vector<1x3x2x128xf32>
    %c0_13 = arith.constant 0 : index
    %c0_14 = arith.constant 0 : index
    %c0_15 = arith.constant 0 : index
    %c0_16 = arith.constant 0 : index
    %34 = vector.load %arg2[%c0_13, %c0_14, %c0_15, %c0_16] : memref<1x3x2x128xf32, #tpu.memory_space<vmem>>, vector<1x3x2x128xf32>
    tpu.vector_store %arg2[%c0_13, %c0_14, %c0_15, %c0_16], %33 {strides = array<i32>} : memref<1x3x2x128xf32, #tpu.memory_space<vmem>>, vector<1x3x2x128xf32>,
    return
  }
  func.func @transform_0(%arg0: i32) -> (i32, i32, i32, i32) {
    %c0_i32 = arith.constant 0 : i32
    %c0_i32_0 = arith.constant 0 : i32
    %c0_i32_1 = arith.constant 0 : i32
    %c0_i32_2 = arith.constant 0 : i32
    return %arg0, %c0_i32, %c0_i32_0, %c0_i32_1 : i32, i32, i32, i32
  }
  func.func @transform_1(%arg0: i32) -> (i32, i32, i32, i32) {
    %c0_i32 = arith.constant 0 : i32
    %c0_i32_0 = arith.constant 0 : i32
    %c0_i32_1 = arith.constant 0 : i32
    %c0_i32_2 = arith.constant 0 : i32
    return %arg0, %c0_i32, %c0_i32_0, %c0_i32_1 : i32, i32, i32, i32
  }
}

</mosaic_0001>

<bundles_post_ra>
// kernel: tpu_custom_call.1
= control target key start
LH: loop header
LB: loop body
LE: loop exit
PB: predicated region body
PF: predicated region fallthrough
CT: control target
= control target key end

     0   :  { %6 = vsyncpa [#allocation3], 0  ;;  %s609_s0 = inlined_call_operand.hbm [shape: f32[2,3,2,128], index: 0, kind: input, shape index: {}]   ;;  %s610_s1 = inlined_call_operand.hbm [shape: f32[2,3,2,128], index: 1, kind: output, shape index: {}]  }
   0x1   :  { %8 = vsyncpa [#allocation3 + $0x1], 0 }
   0x2   :  { %9 = vsyncpa [#allocation4], 0 }
   0x3   :  { %11 = vsyncpa [#allocation4 + $0x1], 0  ;;  %s457_s6 = smov 0   ;;  %s459_s7 = smov 0  }
   0x4   :  { %s461_s8 = smov 0   ;;  %s463_s9 = smov 0  }
   0x5 LB: > { %s478_s10 = sadd.s32 4294967295, %s439_s9   ;;  %s279_s11 = sadd.s32 4294967294, %s439_s9   ;;  %s439_s9 = sphi %s463_s9, %s624_s9   ;;  %s435_s8 = sphi %s461_s8, %s623_s8   ;;  %s431_s7 = sphi %s459_s7, %s622_s7   ;;  %s427_s6 = sphi %s457_s6, %s621_s6  }
   0x6   : > { %s482_s12 = sadd.s32 1, %s439_s9   ;;  %s24_s13 = sadd.s32 1, %s435_s8 }
   0x7   : > { %s21_s14 = ssub.s32 %s439_s9, %s482_s12  ;;  %p31_p0 = scmp.ne.s32.totalorder %s435_s8, %s431_s7 }
   0x8   : > { %p22_p1 = scmp.eq.s32.totalorder %s21_s14, 0  ;;  %p32_p2 = scmp.eq.s32.totalorder %s439_s9, 0 }
   0x9   : > { %p37_p3 = scmp.ne.s32.totalorder %s431_s7, %s427_s6  ;;  %p38_p4 = scmp.eq.s32.totalorder %s478_s10, 0 }
   0xa   : > { %s494_s15 = scalar_select %p22_p1, %s435_s8, %s24_s13  }
   0xb   : > { %p33_p5 = por %p32_p2, %p31_p0  ;;  %p496_p6 = por %p38_p4, %p37_p3 }
   0xc   : > { %p61_p7 = scmp.eq.s32.totalorder %s478_s10, 1  ;;  %p67_p8 = scmp.eq.s32.totalorder %s279_s11, 1 }
   0xd   : > { %s613_s16 = scalar_select %p496_p6, 1, 0 }
   0xe   : > { %p309_p10 = scmp.lt.s32.totalorder %s439_s9, 2  ;;  %p503_p11 = por %p61_p7, %p31_p0 }
   0xf   : > { %p507_p12 = por %p67_p8, %p37_p3  ;;  %s87_s19 = sand.u32 1, %s435_s8  }
  0x10   : > { %s614_s17 = scalar_select %p503_p11, 1, 0 }
  0x11   : > { %s615_s18 = scalar_select %p507_p12, 1, 0 }
  0x12   : > { %s288_s20 = smul.u32 96, %s439_s9  ;;  %p518_p13 = pnand %p309_p10, %p33_p5 }
  0x13   : > { %s287_s21 = smul.u32 6, %s87_s19  ;;  %s524_s28 = scalar_lea.sflag [#allocation3], %s87_s19 }
  0x14   : > { %s516_s24 = scalar_lea.hbm %s609_s0, %s288_s20  ;;  %p349_p1 = pneg %p518_p13 }
  0x15   : > { %s91_s26 = scalar_lea.vmem [#allocation2], %s287_s21  ;;  %s347_s29 = scalar_lea.hbm %s516_s24, 96 }
  0x16   : > { %s98_s27 = sshll.u32 %s91_s26, 4  ;;  %p348_p0 = scmp.ne.s32.totalorder %s516_s24, %s347_s29  ;;  %s522_s27 = int_to_ptr.vmem [resolvable:$true] %s98_s27 }
  0x17   : > { %s352_s3 = scalar_lea.hbm %s609_s0, 192  ;;  %p353_p4 = scmp.lt.s32.totalorder %s516_s24, %s609_s0 }
  0x18   : > { %p350_p2 = pnand %p349_p1, %p348_p0  ;;  %p354_p5 = scmp.lt.s32.totalorder %s352_s3, %s347_s29 }
  0x1a   : > { %p351_p3 = pneg %p350_p2  ;;  %p355_p7 = por %p354_p5, %p353_p4 }
  0x1c   : > { %p356_p8 = pnand %p355_p7, %p351_p3 }
  0x1e   : > { %359 = shalt.err (!%p356_p8)
}
  0x1f   : > { %s360_s11 = scalar_lea.vmem %s522_s27, 96  ;;  %s441_s13 = smov [#allocation2]  }
  0x20   : > { %p361_p10 = scmp.ne.s32.totalorder %s522_s27, %s360_s11  ;;  %s365_s14 = sshll.u32 %s441_s13, 4  ;;  %s366_s14 = int_to_ptr.vmem [resolvable:$false] %s365_s14 }
  0x21   : > { %s367_s19 = scalar_lea.vmem %s366_s14, 192  ;;  %p368_p2 = scmp.lt.s32.totalorder %s522_s27, %s366_s14 }
  0x22   : > { %p363_p9 = pnand %p361_p10, %p349_p1  ;;  %p369_p12 = scmp.lt.s32.totalorder %s367_s19, %s360_s11 }
  0x24   : > { %p364_p0 = pneg %p363_p9  ;;  %p370_p11 = por %p369_p12, %p368_p2 }
  0x26   : > { %p371_p6 = pnand %p370_p11, %p364_p0 }
  0x28   : > { %374 = shalt.err (!%p371_p6)
}
  0x29   : > { %s442_s20 = smov 32   ;;  %s443_s21 = smov 2  }
  0x2a   : > { %304 = dma.hbm_to_vmem [thread:$0]  (!%p518_p13), %s516_s24, 96, %s522_s27, %s524_s28, %s442_s20, %s442_s20, %s443_s21  }
  0x2b   : > { %p283_p9 = scmp.ge.s32.totalorder %s439_s9, 1  ;;  %p106_p1 = scmp.lt.s32.totalorder %s439_s9, 3 }
  0x2d   : > { %p107_p3 = pnand %p283_p9, %p106_p1 }
  0x2e   : > { %s548_s22 = sand.u32 (!%p107_p3), 1, %s431_s7   ;;  %p617_p6 = scmp.ne.s32.totalorder (!%p107_p3), %s613_s16, 0 }
  0x2f   : > { %110 = sbr.rel (%p107_p3) target bundleno = 291 (0x123), region = 24  ;;  %s113_s26 = scalar_lea.sflag (!%p107_p3), [#allocation3], %s548_s22 }
  0x30   : > { %s289_s23 = smul.u32 (!%p107_p3), 6, %s548_s22 }
  0x32   : > { %s116_s29 = scalar_lea.vmem (!%p107_p3), [#allocation2], %s289_s23 }
  0x34   : > { %418 = dma.done.wait (%p617_p6), %s113_s26, 96  }
  0x35   : > { %420 = vsyncadd (%p617_p6), %s113_s26, 4294967200  ;;  %vm138_vm0 = vcmask 1041408   ;;  %v137_v0 = vld [vmem:[%s116_s29 + $0x4] sm:$0x3]  ;;  %v135_v1 = vld [vmem:[%s116_s29] sm:$0x3] }
  0x36   : > { %v136_v2 = vld [vmem:[%s116_s29 + $0x2] sm:$0x3]  ;;  %v162_v3 = vsel %vm138_vm0, %v137_v0, 0.0  ;;  %v139_v4 = vsel %vm138_vm0, %v135_v1, 0.0  ;;  %v178_v27 = vmul.f32 1.7, %v137_v0 }
  0x37   : > { %163 = vadd.xlane.f32.xlu1 %v162_v3  ;;  %140 = vadd.xlane.f32.xlu0 %v139_v4  ;;  %v150_v5 = vsel %vm138_vm0, %v136_v2, 0.0  ;;  %v176_v28 = vmul.f32 1.7, %v135_v1  ;;  %v177_v29 = vmul.f32 1.7, %v136_v2  ;;  %s296_s11 = smul.u32 96, %s478_s10 }
  0x38   : > { %s134_s13 = scalar_lea.vmem [#allocation5], %s289_s23  ;;  %s193_s10 = scalar_lea.sflag [#allocation4], %s548_s22 }
  0x39   : > { %s206_s14 = sshll.u32 %s134_s13, 4  ;;  %s566_s21 = scalar_lea.hbm %s610_s1, %s296_s11  ;;  %s561_s14 = int_to_ptr.vmem [resolvable:$true] %s206_s14 }
  0x3a   : > { %s375_s23 = scalar_lea.vmem %s561_s14, 96  ;;  %p618_p12 = scmp.ne.s32.totalorder %s614_s17, 0 }
  0x3b   : > { %151 = vadd.xlane.f32.xlu0 %v150_v5  ;;  %p376_p11 = scmp.ne.s32.totalorder %s561_s14, %s375_s23  ;;  %s444_s26 = smov [#allocation5]  }
  0x3c   : > { %s379_s29 = sshll.u32 %s444_s26, 4  ;;  %s380_s29 = int_to_ptr.vmem [resolvable:$false] %s379_s29 }
  0x3d   : > { %p377_p13 = pnand %p376_p11, %p618_p12  ;;  %p382_p5 = scmp.lt.s32.totalorder %s561_s14, %s380_s29 }
  0x3f   : > { %p378_p4 = pneg %p377_p13 }
  0xc0   : > { %v164_v6 = vpop.xlane.xlu1 %163  ;;  %v141_v7 = vpop.xlane.xlu0 %140 }
  0xc1   : > { %v165_v8 = vrot.slane %v164_v6, 4  ;;  %v142_v9 = vrot.slane %v141_v7, 4 }
  0xc3   : > { %v166_v10 = vadd.f32 %v165_v8, %v164_v6  ;;  %v143_v11 = vadd.f32 %v142_v9, %v141_v7 }
  0xc4   : > { %v152_v12 = vpop.xlane.xlu0 %151 }
  0xc5   : > { %v167_v13 = vrot.slane %v166_v10, 2  ;;  %v144_v14 = vrot.slane %v143_v11, 2  ;;  %v153_v15 = vrot.slane %v152_v12, 4 }
  0xc7   : > { %v154_v16 = vadd.f32 %v153_v15, %v152_v12  ;;  %v145_v17 = vadd.f32 %v144_v14, %v143_v11  ;;  %v168_v18 = vadd.f32 %v167_v13, %v166_v10 }
  0xc9   : > { %v155_v19 = vrot.slane %v154_v16, 2  ;;  %v146_v20 = vrot.slane %v145_v17, 1  ;;  %v169_v23 = vrot.slane %v168_v18, 1 }
  0xcb   : > { %v156_v21 = vadd.f32 %v155_v19, %v154_v16  ;;  %v147_v22 = vadd.f32 %v146_v20, %v145_v17  ;;  %v170_v26 = vadd.f32 %v169_v23, %v168_v18 }
  0xcd   : > { %290 = vpush %v147_v22  ;;  %v157_v24 = vrot.slane %v156_v21, 1 }
  0xcf   : > { %v158_v25 = vadd.f32 %v157_v24, %v156_v21 }
  0xd1   : > { %292 = vpush %v158_v25 }
  0xd2   : > { %294 = vpush %v170_v26 }
  0xfe   : > { %s291_s16 = spop %290 }
  0xff   : > { %s149_s24 = smul.f32 0.2989, %s291_s16  ;;  %s381_s16 = scalar_lea.vmem %s380_s29, 192 }
 0x100   : > { %p383_p7 = scmp.lt.s32.totalorder %s381_s16, %s375_s23 }
 0x102   : > { %s293_s25 = spop %292  ;;  %p384_p8 = por %p383_p7, %p382_p5 }
 0x103   : > { %s160_s27 = smul.f32 0.587, %s293_s25  ;;  %s295_s28 = spop %294 }
 0x104   : > { %s172_s2 = smul.f32 0.114, %s295_s28  ;;  %p385_p10 = pnand %p384_p8, %p378_p4 }
 0x105   : > { %s161_s30 = sadd.f32 %s160_s27, %s149_s24 }
 0x107   : > { %s173_s3 = sadd.f32 %s172_s2, %s161_s30 }
 0x109   : > { %s174_s4 = smul.f32 0.00390625, %s173_s3 }
 0x10b   : > { %s175_s5 = smul.f32 -0.7, %s174_s4 }
 0x10d   : > { %v179_v30 = vstv %s175_s5 }
 0x10e   : > { %v180_v31 = vadd.f32 %v179_v30, %v176_v28  ;;  %v181_v32 = vadd.f32 %v179_v30, %v177_v29  ;;  %v182_v33 = vadd.f32 %v179_v30, %v178_v27 }
 0x110   : > { %v183_v34 = vmax.f32 %v180_v31, 0.0  ;;  %v184_v35 = vmax.f32 %v181_v32, 0.0  ;;  %v185_v36 = vmax.f32 %v182_v33, 0.0 }
 0x112   : > { %v186_v37 = vmin.f32 %v183_v34, 1.0  ;;  %v187_v38 = vmin.f32 %v184_v35, 1.0  ;;  %v188_v39 = vmin.f32 %v185_v36, 1.0 }
 0x114   : > { %189 = vst [vmem:[%s134_s13] sm:$0x3] %v186_v37  ;;  %190 = vst [vmem:[%s134_s13 + $0x2] sm:$0x3] %v187_v38 }
 0x115   : > { %191 = vst [vmem:[%s134_s13 + $0x4] sm:$0x3] %v188_v39 }
 0x116   : > { %388 = shalt.err (!%p385_p10)
}
 0x117   : > { %s389_s24 = scalar_lea.hbm %s566_s21, 96  ;;  %s393_s28 = scalar_lea.hbm %s610_s1, 192 }
 0x118   : > { %p390_p0 = scmp.ne.s32.totalorder %s566_s21, %s389_s24  ;;  %p394_p1 = scmp.lt.s32.totalorder %s566_s21, %s610_s1 }
 0x119   : > { %p395_p3 = scmp.lt.s32.totalorder %s393_s28, %s389_s24 }
 0x11a   : > { %p391_p2 = pnand %p390_p0, %p618_p12 }
 0x11b   : > { %p396_p6 = por %p395_p3, %p394_p1 }
 0x11c   : > { %p392_p9 = pneg %p391_p2 }
 0x11e   : > { %p397_p11 = pnand %p396_p6, %p392_p9 }
 0x120   : > { %400 = shalt.err (!%p397_p11)
}
 0x121   : > { %s445_s3 = smov 32   ;;  %s446_s4 = smov 2  }
 0x122   : > { %299 = dma.vmem_to_hbm [thread:$0]  (%p618_p12), %s561_s14, 96, %s566_s21, %s193_s10, %s445_s3, %s445_s3, %s446_s4  }
 0x123 PF: > { %s221_s5 = sand.u32 1, %s427_s6   ;;  %p619_p13 = scmp.ne.s32.totalorder %s615_s18, 0 }
 0x124   : > { %p620_p4 = scmp.ge.s32.totalorder %s439_s9, 2  ;;  %s222_s11 = scalar_lea.sflag [#allocation4], %s221_s5 }
 0x126   : > { %p306_p5 = pnand %p620_p4, %p619_p13 }
 0x128   : > { %p307_p7 = pneg %p306_p5 }
 0x12a   : > { %422 = dma.done.wait (%p307_p7), %s222_s11, 96  }
 0x12b   : > { %424 = vsyncadd (%p307_p7), %s222_s11, 4294967200  ;;  %p14_p8 = scmp.ge.s32.totalorder %s482_s12, 4   ;;  %s621_s6 = smov %s431_s7 }
 0x12c   : > { %s622_s7 = smov %s435_s8  ;;  %s623_s8 = smov %s494_s15 }
 0x12d   : > { %s624_s9 = smov %s482_s12  ;;  %16 = sbr.rel (!%p14_p8) target bundleno = 5 (0x5), region = 69 }
 0x132   :  { %227 = vsyncpa [#allocation3], 1 }
 0x133   :  { %229 = vsyncpa [#allocation3 + $0x1], 1 }
 0x134   :  { %230 = vsyncpa [#allocation4], 1 }
 0x135   :  { %232 = vsyncpa [#allocation4 + $0x1], 1 }

</bundles_post_ra>
